<compile_context>
chip_gen: v7x
topology: tpu7x:2x2x1
jax: 0.10.0
libtpu: 0.0.40
codegen_flags: <defaults>
</compile_context>

<pallas_src>
import functools
import math

import jax
import jax.numpy as jnp
from jax.experimental import pallas as pl
from jax.experimental.pallas import tpu as pltpu

EPS = 1e-5  # TF-style LayerNorm epsilon

STACK_NAMES = ['ln1_w', 'ln1_b', 'wqkv', 'bqkv', 'wo', 'bo',
               'ln2_w', 'ln2_b', 'w1', 'b1', 'w2', 'b2']


# ----------------------------- in-kernel helpers -----------------------------

def _layernorm(v, w, b):
    # TF-style layernorm: eps inside the sqrt, biased variance. Kept in f32
    # (v5e has no bf16 VPU); bf16 casts happen only at matmul boundaries.
    u = jnp.mean(v, axis=-1, keepdims=True)
    s = jnp.mean((v - u) ** 2, axis=-1, keepdims=True)
    return w * ((v - u) / jnp.sqrt(s + EPS)) + b


# --------------------------------- kernels -----------------------------------

def embed_kernel(p_ref, w_ref, tok_ref, g_ref, b_ref, o_ref):
    # Fused: patch matmul + cls token + positional embedding + ln_pre.
    # p_ref:  (1, Lp, K) bf16 padded patches (row 0 / padded rows are zero)
    # w_ref:  (K, D)     bf16 patch-embedding weight
    # tok_ref:(Lp, D)    f32  positional embedding (+ class embedding on row 0)
    # g/b:    (1, D)     f32  ln_pre weight / bias
    x = jnp.dot(p_ref[0], w_ref[...], preferred_element_type=jnp.float32) + tok_ref[...]
    o_ref[0] = _layernorm(x, g_ref[...], b_ref[...])


def stack_kernel(x_ref, ln1_w, ln1_b, wqkv, bqkv, wo, bo,
                 ln2_w, ln2_b, w1, b1, w2, b2, o_ref, o_scr,
                 *, n_head, n_tokens):
    # Whole transformer stack.  grid = (B//Bt, n_layers); the (Bt, Lp, D) output
    # block is resident in VMEM across the layer axis and doubles as the
    # residual stream.  o_scr: (Bt*Lp, D) bf16 scratch for per-head outputs.
    l = pl.program_id(1)

    @pl.when(l == 0)
    def _():
        o_ref[...] = x_ref[...]

    Bt, Lp, D = o_ref.shape
    hd = D // n_head
    scale = float(hd) ** -0.5

    x = o_ref[...].reshape(Bt * Lp, D)                 # f32 residual stream

    # ---- attention branch ----
    h = _layernorm(x, ln1_w[0], ln1_b[0]).astype(jnp.bfloat16)
    qkv = jnp.dot(h, wqkv[0], preferred_element_type=jnp.float32) + bqkv[0]  # (M, 3D)
    # exact 1/sqrt(hd) scaling of the q third, applied in f32 (one VPU mul)
    lane = jax.lax.broadcasted_iota(jnp.int32, (1, 3 * D), 1)
    sv = jnp.where(lane < D, scale, 1.0).astype(jnp.float32)
    qkv = (qkv * sv).astype(jnp.bfloat16)

    if n_tokens < Lp:  # mask padded key columns (static Python condition)
        key_col = jax.lax.broadcasted_iota(jnp.int32, (1, Lp), 1)
        key_bias = jnp.where(key_col < n_tokens, 0.0, -1e30).astype(jnp.float32)[None]
    else:
        key_bias = None

    for i in range(n_head):                            # unrolled over heads only
        q_h = qkv[:, i * hd:(i + 1) * hd].reshape(Bt, Lp, hd)
        k_h = qkv[:, D + i * hd:D + (i + 1) * hd].reshape(Bt, Lp, hd)
        v_h = qkv[:, 2 * D + i * hd:2 * D + (i + 1) * hd].reshape(Bt, Lp, hd)
        # sample-batched QK^T contraction over hd (no explicit transpose)
        s = jnp.einsum('bqd,bkd->bqk', q_h, k_h,
                       preferred_element_type=jnp.float32)       # (Bt, Lp, Lp)
        if key_bias is not None:
            s = s + key_bias
        s = s - jnp.max(s, axis=-1, keepdims=True)
        e = jnp.exp(s)
        p = e / jnp.sum(e, axis=-1, keepdims=True)               # exact divide
        o_h = jnp.einsum('bqk,bkd->bqd', p.astype(jnp.bfloat16), v_h,
                         preferred_element_type=jnp.float32)     # (Bt, Lp, hd)
        # park the head output at its static lane offset; one wo matmul later
        o_scr[:, i * hd:(i + 1) * hd] = o_h.reshape(Bt * Lp, hd).astype(jnp.bfloat16)

    attn = jnp.dot(o_scr[...], wo[0], preferred_element_type=jnp.float32) + bo[0]
    x = x + attn

    # ---- MLP branch (QuickGELU) ----
    h2 = _layernorm(x, ln2_w[0], ln2_b[0]).astype(jnp.bfloat16)
    a = jnp.dot(h2, w1[0], preferred_element_type=jnp.float32) + b1[0]
    g = (a * jax.nn.sigmoid(1.702 * a)).astype(jnp.bfloat16)
    x = x + jnp.dot(g, w2[0], preferred_element_type=jnp.float32) + b2[0]

    o_ref[...] = x.reshape(Bt, Lp, D)


def head_kernel(x_ref, g_ref, b_ref, proj_ref, o_ref):
    # x_ref: (B, D) cls tokens; proj: (D, output_dim) bf16
    xn = _layernorm(x_ref[...], g_ref[...], b_ref[...])
    o_ref[...] = jnp.dot(xn.astype(jnp.bfloat16), proj_ref[...],
                         preferred_element_type=jnp.float32)


# ------------------------------ pallas wrappers -------------------------------

def _const_spec(shape):
    nd = len(shape)

    def imap(*_):
        return (0,) * nd

    return pl.BlockSpec(shape, imap)


def _vmem_capacity_bytes():
    try:
        info = pltpu.get_tpu_info()
        return int(getattr(info, 'vmem_capacity_bytes', 128 * 1024 * 1024))
    except Exception:
        return 128 * 1024 * 1024


def _choose_batch_tile(B, Lp, D, layer_bytes, vmem_limit):
    # Per-sample VMEM footprint (conservative): residual in+out double-buffered
    # f32, qkv (f32 + bf16), MLP hidden (f32 + bf16), per-head scores/probs f32,
    # attention output scratch bf16.
    per_sample = (4 * Lp * D * 4
                  + Lp * 3 * D * (4 + 2)
                  + Lp * 4 * D * (4 + 2)
                  + 2 * Lp * Lp * 4
                  + Lp * D * 2)
    budget = vmem_limit - 2 * layer_bytes - (4 << 20)   # weights double-buffered + headroom
    cap = max(1, min(8, budget // max(per_sample, 1)))
    bt = 1
    for d in range(1, B + 1):
        if B % d == 0 and d <= cap:
            bt = d
    return bt


def prepare_params(params):
    """Stack per-layer weights, fuse q/k/v weights and biases, cast matmul
    weights to bf16 and pad the positional embedding to a 16-aligned token count."""
    L, D = params['pos_emb'].shape
    Lp = ((L + 15) // 16) * 16
    blocks = params['blocks']

    def stack(name):
        return jnp.stack([b[name] for b in blocks], axis=0)

    wqkv = jnp.concatenate([stack('wq'), stack('wk'), stack('wv')], axis=-1)  # (nl, D, 3D)
    bqkv = jnp.concatenate([stack('bq'), stack('bk'), stack('bv')], axis=-1)  # (nl, 1, 3D)
    stacked = {
        'ln1_w': stack('ln1_w'), 'ln1_b': stack('ln1_b'),
        'wqkv': wqkv.astype(jnp.bfloat16), 'bqkv': bqkv,
        'wo': stack('wo').astype(jnp.bfloat16), 'bo': stack('bo'),
        'ln2_w': stack('ln2_w'), 'ln2_b': stack('ln2_b'),
        'w1': stack('w1').astype(jnp.bfloat16), 'b1': stack('b1'),
        'w2': stack('w2').astype(jnp.bfloat16), 'b2': stack('b2'),
    }
    pos_pad = jnp.zeros((Lp, D), jnp.float32).at[:L, :].set(params['pos_emb'])
    tok = pos_pad.at[0, :].add(params['class_emb'])   # fold cls token into row 0
    prep = {
        'w_patch': params['conv_w'].reshape(D, -1).T.astype(jnp.bfloat16),  # (K, D)
        'tok': tok,
        'ln_pre_w': params['ln_pre_w'], 'ln_pre_b': params['ln_pre_b'],
        'ln_post_w': params['ln_post_w'], 'ln_post_b': params['ln_post_b'],
        'proj': params['proj'].astype(jnp.bfloat16),
        'stacked': stacked,
    }
    return prep, L, Lp


def visual_transformer_forward(x_nchw, prep, *, patch_size, heads, seq_len, seq_pad,
                               batch_tile=None):
    B, C, H, W = x_nchw.shape
    D = prep['tok'].shape[1]
    out_dim = prep['proj'].shape[1]
    gh, gw = H // patch_size, W // patch_size
    P = gh * gw
    K = C * patch_size * patch_size
    L, Lp = seq_len, seq_pad
    stacked = prep['stacked']
    n_layers = stacked['wqkv'].shape[0]

    # Per-generation VMEM budgeting: ~51 MiB limit on v7x (64 MiB/TC), 100 MiB
    # on v5e/v6e (128 MiB).  Bt sized so double-buffered layer weights plus
    # Bt samples of activations fit under the limit.
    layer_bytes = sum(math.prod(stacked[n].shape[1:]) * stacked[n].dtype.itemsize
                      for n in STACK_NAMES)
    vmem_limit = min(int(_vmem_capacity_bytes() * 0.8), 100 * 1024 * 1024)
    Bt = batch_tile if batch_tile is not None else _choose_batch_tile(
        B, Lp, D, layer_bytes, vmem_limit)
    assert B % Bt == 0

    # conv1 (stride == kernel_size, no bias) == patch extraction + matmul (glue).
    # Row 0 (cls) and padded rows are zero so the matmul leaves them untouched.
    patches = x_nchw.reshape(B, C, gh, patch_size, gw, patch_size)
    patches = patches.transpose(0, 2, 4, 1, 3, 5).reshape(B, P, K)
    patches_pad = jnp.zeros((B, Lp, K), jnp.float32).at[:, 1:P + 1, :].set(patches)
    patches_pad = patches_pad.astype(jnp.bfloat16)

    # fused patch-embed + cls token + pos-emb + ln_pre  ->  (B, Lp, D) f32
    # TODO(synk): could be folded into the stack kernel's l==0 phase (minor win).
    x = pl.pallas_call(
        embed_kernel,
        grid=(B,),
        in_specs=[pl.BlockSpec((1, Lp, K), lambda b: (b, 0, 0)),
                  _const_spec((K, D)),
                  _const_spec((Lp, D)),
                  _const_spec((1, D)),
                  _const_spec((1, D))],
        out_specs=pl.BlockSpec((1, Lp, D), lambda b: (b, 0, 0)),
        out_shape=jax.ShapeDtypeStruct((B, Lp, D), jnp.float32),
        compiler_params=pltpu.CompilerParams(dimension_semantics=("parallel",)),
    )(patches_pad, prep['w_patch'], prep['tok'], prep['ln_pre_w'], prep['ln_pre_b'])

    # fused transformer stack: grid=(B//Bt, layers); the (Bt, Lp, D) residual is
    # resident in VMEM across the layer axis, stacked weights are streamed
    # (double-buffered) along it and amortized over Bt samples per fetch.
    in_specs = [pl.BlockSpec((Bt, Lp, D), lambda bt, l: (bt, 0, 0))]
    for n in STACK_NAMES:
        shp = stacked[n].shape
        in_specs.append(pl.BlockSpec((1,) + tuple(shp[1:]), lambda bt, l: (l, 0, 0)))
    x = pl.pallas_call(
        functools.partial(stack_kernel, n_head=heads, n_tokens=L),
        grid=(B // Bt, n_layers),
        in_specs=in_specs,
        out_specs=pl.BlockSpec((Bt, Lp, D), lambda bt, l: (bt, 0, 0)),
        out_shape=jax.ShapeDtypeStruct((B, Lp, D), jnp.float32),
        scratch_shapes=[pltpu.VMEM((Bt * Lp, D), jnp.bfloat16)],
        compiler_params=pltpu.CompilerParams(
            dimension_semantics=("parallel", "arbitrary"),
            vmem_limit_bytes=vmem_limit),
    )(x, *[stacked[n] for n in STACK_NAMES])

    # pool_type == 'default': take cls token, ln_post, project
    # TODO(synk): 'average'/'linear' pool types and the MIM branch (forward_mim)
    # are not implemented; only the default inference path is covered.
    cls_tok = x[:, 0, :]                                   # (B, D)
    out = pl.pallas_call(
        head_kernel,
        grid=(1,),
        in_specs=[_const_spec((B, D)),
                  _const_spec((1, D)),
                  _const_spec((1, D)),
                  _const_spec((D, out_dim))],
        out_specs=_const_spec((B, out_dim)),
        out_shape=jax.ShapeDtypeStruct((B, out_dim), jnp.float32),
    )(cls_tok, prep['ln_post_w'], prep['ln_post_b'], prep['proj'])
    return out


# ------------------------------- parameter init --------------------------------

def init_params(key, width, layers, heads, patch_size, output_dim, seq_len):
    # Deterministic synthetic init mirroring the module's shapes
    # (trunc_normal(std=0.02) approximated by normal*0.02; LN weight=1, bias=0).
    std = 0.02
    scale = width ** -0.5
    keys = jax.random.split(key, 4 + layers)
    p = {
        'conv_w': jax.random.normal(keys[0], (width, 3, patch_size, patch_size), jnp.float32) * std,
        'class_emb': jax.random.normal(keys[1], (width,), jnp.float32) * scale,
        'pos_emb': jax.random.normal(keys[2], (seq_len, width), jnp.float32) * scale,
        'proj': jax.random.normal(keys[3], (width, output_dim), jnp.float32) * scale,
        'ln_pre_w': jnp.ones((1, width), jnp.float32),
        'ln_pre_b': jnp.zeros((1, width), jnp.float32),
        'ln_post_w': jnp.ones((1, width), jnp.float32),
        'ln_post_b': jnp.zeros((1, width), jnp.float32),
    }
    blocks = []
    for i in range(layers):
        bk = jax.random.split(keys[4 + i], 4)
        wqkv = jax.random.normal(bk[0], (3 * width, width), jnp.float32) * std
        blk = dict(
            ln1_w=jnp.ones((1, width), jnp.float32), ln1_b=jnp.zeros((1, width), jnp.float32),
            wq=wqkv[:width].T, bq=jnp.zeros((1, width), jnp.float32),
            wk=wqkv[width:2 * width].T, bk=jnp.zeros((1, width), jnp.float32),
            wv=wqkv[2 * width:].T, bv=jnp.zeros((1, width), jnp.float32),
            wo=(jax.random.normal(bk[1], (width, width), jnp.float32) * std).T,
            bo=jnp.zeros((1, width), jnp.float32),
            ln2_w=jnp.ones((1, width), jnp.float32), ln2_b=jnp.zeros((1, width), jnp.float32),
            w1=(jax.random.normal(bk[2], (4 * width, width), jnp.float32) * std).T,
            b1=jnp.zeros((1, 4 * width), jnp.float32),
            w2=(jax.random.normal(bk[3], (width, 4 * width), jnp.float32) * std).T,
            b2=jnp.zeros((1, width), jnp.float32),
        )
        blocks.append(blk)
    p['blocks'] = blocks
    return p


# ------------------------------ pure-JAX reference ------------------------------

def reference_forward(x_nchw, params, *, patch_size, heads):
    B, C, H, W = x_nchw.shape
    D = params['pos_emb'].shape[1]
    gh = H // patch_size
    P = gh * gh
    K = C * patch_size * patch_size
    patches = x_nchw.reshape(B, C, gh, patch_size, gh, patch_size)
    patches = patches.transpose(0, 2, 4, 1, 3, 5).reshape(B, P, K)
    x = patches @ params['conv_w'].reshape(D, K).T
    cls = jnp.broadcast_to(params['class_emb'][None, None, :], (B, 1, D))
    x = jnp.concatenate([cls, x], axis=1) + params['pos_emb'][None]

    def ln(v, w, b):
        u = v.mean(-1, keepdims=True)
        s = ((v - u) ** 2).mean(-1, keepdims=True)
        return w * ((v - u) / jnp.sqrt(s + EPS)) + b

    x = ln(x, params['ln_pre_w'][0], params['ln_pre_b'][0])
    hd = D // heads
    for blk in params['blocks']:
        h = ln(x, blk['ln1_w'][0], blk['ln1_b'][0])
        q = (h @ blk['wq'] + blk['bq'][0]) * (hd ** -0.5)
        k = h @ blk['wk'] + blk['bk'][0]
        v = h @ blk['wv'] + blk['bv'][0]
        L = x.shape[1]
        q = q.reshape(B, L, heads, hd).transpose(0, 2, 1, 3)
        k = k.reshape(B, L, heads, hd).transpose(0, 2, 1, 3)
        v = v.reshape(B, L, heads, hd).transpose(0, 2, 1, 3)
        s = jnp.einsum('bhqd,bhkd->bhqk', q, k)
        p = jax.nn.softmax(s, axis=-1)
        o = jnp.einsum('bhqk,bhkd->bhqd', p, v).transpose(0, 2, 1, 3).reshape(B, L, D)
        x = x + (o @ blk['wo'] + blk['bo'][0])
        h2 = ln(x, blk['ln2_w'][0], blk['ln2_b'][0])
        a = h2 @ blk['w1'] + blk['b1'][0]
        g = a * jax.nn.sigmoid(1.702 * a)
        x = x + (g @ blk['w2'] + blk['b2'][0])
    cls_tok = x[:, 0, :]
    y = ln(cls_tok, params['ln_post_w'][0], params['ln_post_b'][0])
    return y @ params['proj']


# ------------------------------------ main --------------------------------------

if __name__ == "__main__":
    # Small config: input_resolution=16, patch_size=8, width=32, layers=2,
    # heads=4, output_dim=16  ->  sequence_length = (16//8)**2 + 1 = 5 (padded to 16)
    B, C, H, patch = 2, 3, 16, 8
    width, layers, heads, out_dim = 32, 2, 4, 16
    seq_len = (H // patch) ** 2 + 1

    key = jax.random.PRNGKey(0)
    kx, kp = jax.random.split(key)
    x = jax.random.normal(kx, (B, C, H, H), jnp.float32)
    params = init_params(kp, width, layers, heads, patch, out_dim, seq_len)

    prep, L, Lp = prepare_params(params)
    out = visual_transformer_forward(x, prep, patch_size=patch, heads=heads,
                                     seq_len=L, seq_pad=Lp)
    out = jax.block_until_ready(out)

    ref = reference_forward(x, params, patch_size=patch, heads=heads)
    assert out.shape == (B, out_dim)
    max_err = float(jnp.max(jnp.abs(out - ref)))
    # bf16 matmul operands -> looser tolerance than pure f32.
    assert jnp.allclose(out, ref, atol=3e-2, rtol=3e-2), f"max abs err {max_err}"
    print("KERNEL_OK")
</pallas_src>

<mosaic_0001>
module attributes {stable_mosaic.version = 11 : i64} {
  func.func @embed_kernel(%arg0: i32, %arg1: memref<1x16x192xbf16, #tpu.memory_space<vmem>>, %arg2: memref<192x32xbf16, #tpu.memory_space<vmem>>, %arg3: memref<16x32xf32, #tpu.memory_space<vmem>>, %arg4: memref<1x32xf32, #tpu.memory_space<vmem>>, %arg5: memref<1x32xf32, #tpu.memory_space<vmem>>, %arg6: memref<1x16x32xf32, #tpu.memory_space<vmem>>) attributes {dimension_semantics = [#tpu.dimension_semantics<parallel>], iteration_bounds = array<i64: 2>, scalar_prefetch = 0 : i64, scratch_operands = 0 : i64, tpu.core_type = #tpu.core_type<tc>, window_params = [{transform_indices = @transform_0, window_bounds = array<i64: 1, 16, 192>}, {pipeline_mode = #tpu.pipeline_mode<synchronous>, transform_indices = @transform_1, window_bounds = array<i64: 192, 32>}, {pipeline_mode = #tpu.pipeline_mode<synchronous>, transform_indices = @transform_2, window_bounds = array<i64: 16, 32>}, {pipeline_mode = #tpu.pipeline_mode<synchronous>, transform_indices = @transform_3, window_bounds = array<i64: 1, 32>}, {pipeline_mode = #tpu.pipeline_mode<synchronous>, transform_indices = @transform_4, window_bounds = array<i64: 1, 32>}, {transform_indices = @transform_5, window_bounds = array<i64: 1, 16, 32>}]} {
    %c0 = arith.constant 0 : index
    %c0_0 = arith.constant 0 : index
    %c0_1 = arith.constant 0 : index
    %0 = vector.load %arg1[%c0, %c0_0, %c0_1] : memref<1x16x192xbf16, #tpu.memory_space<vmem>>, vector<1x16x192xbf16>
    %1 = vector.shape_cast %0 : vector<1x16x192xbf16> to vector<16x192xbf16>
    %c0_2 = arith.constant 0 : index
    %c0_3 = arith.constant 0 : index
    %2 = vector.load %arg2[%c0_2, %c0_3] : memref<192x32xbf16, #tpu.memory_space<vmem>>, vector<192x32xbf16>
    %cst = arith.constant dense<0.000000e+00> : vector<16x32xf32>
    %3 = tpu.matmul %1, %2, %cst {dimension_numbers = #tpu.dot_dimension_numbers<[1], [0], [0], [1], [0, 0, 1, 1], [], []>} : vector<16x192xbf16>, vector<192x32xbf16>, vector<16x32xf32> -> vector<16x32xf32>
    %c0_4 = arith.constant 0 : index
    %c0_5 = arith.constant 0 : index
    %4 = vector.load %arg3[%c0_4, %c0_5] : memref<16x32xf32, #tpu.memory_space<vmem>>, vector<16x32xf32>
    %5 = arith.addf %3, %4 : vector<16x32xf32>
    %c0_6 = arith.constant 0 : index
    %c0_7 = arith.constant 0 : index
    %6 = vector.load %arg4[%c0_6, %c0_7] : memref<1x32xf32, #tpu.memory_space<vmem>>, vector<1x32xf32>
    %c0_8 = arith.constant 0 : index
    %c0_9 = arith.constant 0 : index
    %7 = vector.load %arg5[%c0_8, %c0_9] : memref<1x32xf32, #tpu.memory_space<vmem>>, vector<1x32xf32>
    %cst_10 = arith.constant dense<0.000000e+00> : vector<16xf32>
    %8 = vector.multi_reduction <add>, %5, %cst_10 [1] : vector<16x32xf32> to vector<16xf32>
    %9 = vector.shape_cast %8 : vector<16xf32> to vector<16x1xf32>
    %cst_11 = arith.constant 3.200000e+01 : f32
    %10 = vector.broadcast %cst_11 : f32 to vector<16x1xf32>
    %11 = arith.divf %9, %10 : vector<16x1xf32>
    %12 = vector.broadcast %11 : vector<16x1xf32> to vector<16x32xf32>
    %13 = arith.subf %5, %12 : vector<16x32xf32>
    %14 = arith.mulf %13, %13 : vector<16x32xf32>
    %cst_12 = arith.constant dense<0.000000e+00> : vector<16xf32>
    %15 = vector.multi_reduction <add>, %14, %cst_12 [1] : vector<16x32xf32> to vector<16xf32>
    %16 = vector.shape_cast %15 : vector<16xf32> to vector<16x1xf32>
    %cst_13 = arith.constant 3.200000e+01 : f32
    %17 = vector.broadcast %cst_13 : f32 to vector<16x1xf32>
    %18 = arith.divf %16, %17 : vector<16x1xf32>
    %19 = vector.broadcast %11 : vector<16x1xf32> to vector<16x32xf32>
    %20 = arith.subf %5, %19 : vector<16x32xf32>
    %cst_14 = arith.constant 9.99999974E-6 : f32
    %21 = vector.broadcast %cst_14 : f32 to vector<16x1xf32>
    %22 = arith.addf %18, %21 : vector<16x1xf32>
    %23 = math.sqrt %22 : vector<16x1xf32>
    %24 = vector.broadcast %23 : vector<16x1xf32> to vector<16x32xf32>
    %25 = arith.divf %20, %24 : vector<16x32xf32>
    %26 = vector.broadcast %6 : vector<1x32xf32> to vector<16x32xf32>
    %27 = arith.mulf %26, %25 : vector<16x32xf32>
    %28 = vector.broadcast %7 : vector<1x32xf32> to vector<16x32xf32>
    %29 = arith.addf %27, %28 : vector<16x32xf32>
    %c0_15 = arith.constant 0 : index
    %c0_16 = arith.constant 0 : index
    %c0_17 = arith.constant 0 : index
    %30 = vector.load %arg6[%c0_15, %c0_16, %c0_17] : memref<1x16x32xf32, #tpu.memory_space<vmem>>, vector<1x16x32xf32>
    %31 = vector.shape_cast %30 : vector<1x16x32xf32> to vector<16x32xf32>
    %32 = vector.shape_cast %29 : vector<16x32xf32> to vector<1x16x32xf32>
    tpu.vector_store %arg6[%c0_15, %c0_16, %c0_17], %32 {strides = array<i32>} : memref<1x16x32xf32, #tpu.memory_space<vmem>>, vector<1x16x32xf32>,
    return
  }
  func.func @transform_0(%arg0: i32) -> (i32, i32, i32) {
    %c0_i32 = arith.constant 0 : i32
    %c0_i32_0 = arith.constant 0 : i32
    %c0_i32_1 = arith.constant 0 : i32
    return %arg0, %c0_i32, %c0_i32_0 : i32, i32, i32
  }
  func.func @transform_1(%arg0: i32) -> (i32, i32) {
    %c0_i32 = arith.constant 0 : i32
    %c0_i32_0 = arith.constant 0 : i32
    %c0_i32_1 = arith.constant 0 : i32
    return %c0_i32, %c0_i32_0 : i32, i32
  }
  func.func @transform_2(%arg0: i32) -> (i32, i32) {
    %c0_i32 = arith.constant 0 : i32
    %c0_i32_0 = arith.constant 0 : i32
    %c0_i32_1 = arith.constant 0 : i32
    return %c0_i32, %c0_i32_0 : i32, i32
  }
  func.func @transform_3(%arg0: i32) -> (i32, i32) {
    %c0_i32 = arith.constant 0 : i32
    %c0_i32_0 = arith.constant 0 : i32
    %c0_i32_1 = arith.constant 0 : i32
    return %c0_i32, %c0_i32_0 : i32, i32
  }
  func.func @transform_4(%arg0: i32) -> (i32, i32) {
    %c0_i32 = arith.constant 0 : i32
    %c0_i32_0 = arith.constant 0 : i32
    %c0_i32_1 = arith.constant 0 : i32
    return %c0_i32, %c0_i32_0 : i32, i32
  }
  func.func @transform_5(%arg0: i32) -> (i32, i32, i32) {
    %c0_i32 = arith.constant 0 : i32
    %c0_i32_0 = arith.constant 0 : i32
    %c0_i32_1 = arith.constant 0 : i32
    return %arg0, %c0_i32, %c0_i32_0 : i32, i32, i32
  }
}

</mosaic_0001>

<bundles_post_ra>
// kernel: tpu_custom_call.1
= control target key start
LH: loop header
LB: loop body
LE: loop exit
PB: predicated region body
PF: predicated region fallthrough
CT: control target
= control target key end

     0   :  { %10 = vsyncpa [#allocation3], 0  ;;  %s867_s0 = inlined_call_operand.vmem [shape: bf16[2,16,192], index: 0, kind: input, shape index: {}]   ;;  %s868_s1 = inlined_call_operand.vmem [shape: bf16[192,32], index: 1, kind: input, shape index: {}]   ;;  %s869_s2 = inlined_call_operand.vmem [shape: f32[16,32], index: 2, kind: input, shape index: {}]   ;;  %s870_s3 = inlined_call_operand.vmem [shape: f32[1,32], index: 3, kind: input, shape index: {}]   ;;  %s871_s4 = inlined_call_operand.vmem [shape: f32[1,32], index: 4, kind: input, shape index: {}]   ;;  %s872_s5 = inlined_call_operand.hbm [shape: f32[2,16,32], index: 5, kind: output, shape index: {}]  }
   0x1   :  { %12 = vsyncpa [#allocation3 + $0x1], 0  ;;  %s710_s18 = smov 0   ;;  %s712_s19 = smov 0  }
   0x2   :  { %s714_s20 = smov 0   ;;  %s716_s21 = smov 0  }
   0x3 LB: > { %s731_s22 = sadd.s32 4294967295, %s674_s21   ;;  %s516_s23 = sadd.s32 4294967294, %s674_s21   ;;  %s674_s21 = sphi %s716_s21, %s878_s21   ;;  %s670_s20 = sphi %s714_s20, %s877_s20   ;;  %s666_s19 = sphi %s712_s19, %s876_s19   ;;  %s662_s18 = sphi %s710_s18, %s875_s18  }
   0x4   : > { %s735_s24 = sadd.s32 1, %s674_s21   ;;  %s135_s25 = sadd.s32 1, %s670_s20 }
   0x5   : > { %s132_s26 = ssub.s32 %s674_s21, %s735_s24  ;;  %p145_p0 = scmp.ne.s32.totalorder %s670_s20, %s666_s19 }
   0x6   : > { %p133_p1 = scmp.eq.s32.totalorder %s132_s26, 0  ;;  %p146_p2 = scmp.eq.s32.totalorder %s731_s22, 1 }
   0x7   : > { %p151_p3 = scmp.ne.s32.totalorder %s666_s19, %s662_s18  ;;  %p152_p4 = scmp.eq.s32.totalorder %s516_s23, 1 }
   0x8   : > { %s746_s27 = scalar_select %p133_p1, %s670_s20, %s135_s25  }
   0x9   : > { %p748_p5 = por %p146_p2, %p145_p0  ;;  %p752_p6 = por %p152_p4, %p151_p3 }
   0xa   : > { %p519_p7 = scmp.ge.s32.totalorder %s674_s21, 1  ;;  %p190_p8 = scmp.lt.s32.totalorder %s674_s21, 3 }
   0xc   : > { %p191_p9 = pnand %p519_p7, %p190_p8 }
   0xd   : > { %v589_v0 = vld [vmem:[%s868_s1] sm:$0xff] (!%p191_p9)   ;;  %v676_v1 = vmov (!%p191_p9), 0   ;;  %p218_p10 = scmp.lt.s32.totalorder (!%p191_p9), %s731_s22, 1  ;;  %v590_v2 = vld [vmem:[%s868_s1 + $0x8] sm:$0xff] (!%p191_p9)   ;;  %v591_v3 = vld [vmem:[%s868_s1 + $0x10] sm:$0xff] (!%p191_p9)   ;;  %vm333_vm0 = vcmask (!%p191_p9), 523264  }
   0xe   : > { %194 = sbr.rel (%p191_p9) target bundleno = 623 (0x26f), region = 40  ;;  %337 = vmatprep.subr.bf16.mxu0 (!%p191_p9), %v676_v1  ;;  %v592_v4 = vld [vmem:[%s868_s1 + $0x18] sm:$0xff] (!%p191_p9)   ;;  %v593_v6 = vld [vmem:[%s868_s1 + $0x20] sm:$0xff] (!%p191_p9)   ;;  %v594_v7 = vld [vmem:[%s868_s1 + $0x28] sm:$0xff] (!%p191_p9)   ;;  %vm380_vm1 = vcmask (!%p191_p9), 261120   ;;  %s677_s26 = smov (!%p191_p9), [#allocation2]  }
   0xf   : > { %338 = vmatpush1.bf16.msra.mxu0 (!%p191_p9), %v589_v0  ;;  %v595_v8 = vld [vmem:[%s868_s1 + $0x30] sm:$0xff] (!%p191_p9)   ;;  %v596_v9 = vld [vmem:[%s868_s1 + $0x38] sm:$0xff] (!%p191_p9)   ;;  %v597_v10 = vld [vmem:[%s868_s1 + $0x40] sm:$0xff] (!%p191_p9)   ;;  %s616_s30 = sshll.u32 (!%p191_p9), %s677_s26, 4  ;;  %s617_s30 = int_to_ptr.vmem [resolvable:$false] %s616_s30 }
  0x10   : > { %339 = vmatprep.subr.bf16.mxu0 (!%p191_p9), %v676_v1  ;;  %v598_v11 = vld [vmem:[%s868_s1 + $0x48] sm:$0xff] (!%p191_p9)   ;;  %v599_v12 = vld [vmem:[%s868_s1 + $0x50] sm:$0xff] (!%p191_p9)   ;;  %v600_v13 = vld [vmem:[%s868_s1 + $0x58] sm:$0xff] (!%p191_p9)   ;;  %s618_s6 = scalar_lea.vmem (!%p191_p9), %s617_s30, 512 }
  0x11   : > { %v250_v15 = vld [vmem:[%s869_s2] sm:$0xff] (!%p191_p9)  ;;  %v251_v17 = vld [vmem:[%s869_s2 + $0x8] sm:$0xff] (!%p191_p9) }
  0x12   : > { %v538_v52 = vld [vmem:[%s870_s3] ss:$0 sm:$0xff] (!%p191_p9) }
  0x13   : > { %340 = vmatpush1.bf16.msra.mxu0 (!%p191_p9), %v590_v2  ;;  %v539_v54 = vld [vmem:[%s871_s4] ss:$0 sm:$0xff] (!%p191_p9) }
  0x14   : > { %341 = vmatprep.subr.bf16.mxu0 (!%p191_p9), %v676_v1 }
  0x15   : > { %s219_s9 = scalar_select %p218_p10, %s731_s22, 1 }
  0x17   : > { %s545_s12 = sshll.u32 %s219_s9, 4  ;;  %342 = vmatpush1.bf16.msra.mxu0 %v591_v3 }
  0x18   : > { %s222_s17 = scalar_lea.vmem %s867_s0, %s545_s12  ;;  %343 = vmatprep.subr.bf16.mxu0 %v676_v1  ;;  %s546_s12 = sshll.u32 %s731_s22, 8 }
  0x19   : > { %v603_v5 = vld [vmem:[%s222_s17 + $0x4] ss:$8 sps:$4 sm:$0xff]   ;;  %v601_v14 = vld [vmem:[%s222_s17] ss:$8 sps:$4 sm:$0xff]   ;;  %s215_s17 = sand.u32 1, %s666_s19   ;;  %s821_s23 = scalar_lea.hbm %s872_s5, %s546_s12 }
  0x1a   : > { %537 = vmatprep.mubr.msk.bf16.mxu0 %vm333_vm0, %v603_v5  ;;  %s520_s9 = sshll.u32 %s215_s17, 4  ;;  %s826_s25 = scalar_lea.sflag [#allocation3], %s215_s17 }
  0x1b   : > { %344 = vmatpush1.bf16.msra.mxu0 %v592_v4  ;;  %s217_s13 = scalar_lea.vmem [#allocation2], %s520_s9 }
  0x1c   : > { %345 = vmatprep.subr.bf16.mxu0 %v676_v1  ;;  %s454_s14 = sshll.u32 %s217_s13, 4  ;;  %s823_s14 = int_to_ptr.vmem [resolvable:$true] %s454_s14 }
  0x1d   : > { %s612_s22 = scalar_lea.vmem %s823_s14, 256  ;;  %p619_p0 = scmp.lt.s32.totalorder %s823_s14, %s617_s30 }
  0x1e   : > { %p613_p11 = scmp.ne.s32.totalorder %s823_s14, %s612_s22  ;;  %p620_p1 = scmp.lt.s32.totalorder %s618_s6, %s612_s22 }
  0x1f   : > { %346 = vmatpush1.bf16.msra.mxu0 %v593_v6 }
  0x20   : > { %347 = vmatprep.subr.bf16.mxu0 %v676_v1  ;;  %p614_p12 = pnand %p613_p11, %p748_p5  ;;  %p621_p2 = por %p620_p1, %p619_p0 }
  0x22   : > { %p615_p13 = pneg %p614_p12 }
  0x23   : > { %348 = vmatpush1.bf16.msra.mxu0 %v594_v7 }
  0x24   : > { %349 = vmatprep.subr.bf16.mxu0 %v676_v1  ;;  %p622_p3 = pnand %p621_p2, %p615_p13 }
  0x27   : > { %350 = vmatpush1.bf16.msra.mxu0 %v595_v8 }
  0x28   : > { %351 = vmatprep.subr.bf16.mxu0 %v676_v1 }
  0x2b   : > { %352 = vmatpush1.bf16.msra.mxu0 %v596_v9 }
  0x2c   : > { %353 = vmatprep.subr.bf16.mxu0 %v676_v1 }
  0x2f   : > { %354 = vmatpush1.bf16.msra.mxu0 %v597_v10 }
  0x30   : > { %355 = vmatprep.subr.bf16.mxu0 %v676_v1 }
  0x33   : > { %356 = vmatpush1.bf16.msra.mxu0 %v598_v11 }
  0x34   : > { %357 = vmatprep.subr.bf16.mxu0 %v676_v1 }
  0x37   : > { %358 = vmatpush1.bf16.msra.mxu0 %v599_v12 }
  0x38   : > { %359 = vmatprep.subr.bf16.mxu0 %v676_v1 }
  0x3b   : > { %360 = vmatpush1.bf16.msra.mxu0 %v600_v13 }
  0x3e   : > { %370 = vmatmul.mubr.bf16.vlgmr.msra.gmra.mrb[0].mxu0 %v601_v14 }
 0x111   : > { %v371_v16 = vpop.f32.mrb[0].mxu0 }
 0x112   : > { %v372_v18 = vadd.f32 %v371_v16, %v250_v15  ;;  %v373_v19 = vpop.f32.mrb[1].mxu0 }
 0x113   : > { %v374_v20 = vpop.f32.mrb[2].mxu0 }
 0x114   : > { %v375_v21 = vadd.f32 %v374_v20, %v251_v17  ;;  %v376_v22 = vpop.f32.mrb[3].mxu0  ;;  %v381_v23 = vsel %vm380_vm1, %v372_v18, 0.0 }
 0x115   : > { %382 = vadd.xlane.f32.xlu0 %v381_v23 }
 0x116   : > { %v384_v24 = vsel %vm380_vm1, %v375_v21, 0.0 }
 0x119   : > { %385 = vadd.xlane.f32.xlu0 %v384_v24 }
 0x1a2   : > { %v383_v25 = vpop.xlane.xlu0 %382 }
 0x1a3   : > { %v388_v26 = vmul.f32 0.03125, %v383_v25 }
 0x1a5   : > { %v390_v27 = vsub.f32 %v372_v18, %v388_v26 }
 0x1a6   : > { %v386_v28 = vpop.xlane.xlu0 %385 }
 0x1a7   : > { %v389_v29 = vmul.f32 0.03125, %v386_v28  ;;  %v392_v30 = vmul.f32 %v390_v27, %v390_v27 }
 0x1a9   : > { %v391_v31 = vsub.f32 %v375_v21, %v389_v29  ;;  %v394_v32 = vsel %vm380_vm1, %v392_v30, 0.0 }
 0x1aa   : > { %395 = vadd.xlane.f32.xlu1 %v394_v32 }
 0x1ab   : > { %v393_v33 = vmul.f32 %v391_v31, %v391_v31 }
 0x1ad   : > { %v397_v34 = vsel %vm380_vm1, %v393_v33, 0.0 }
 0x1ae   : > { %398 = vadd.xlane.f32.xlu1 %v397_v34 }
 0x237   : > { %v396_v35 = vpop.xlane.xlu1 %395 }
 0x238   : > { %v400_v36 = vmul.f32 0.03125, %v396_v35 }
 0x23a   : > { %v402_v37 = vadd.f32 1e-05, %v400_v36 }
 0x23b   : > { %v399_v38 = vpop.xlane.xlu1 %398 }
 0x23c   : > { %604 = vrsqrt.f32 %v402_v37  ;;  %v401_v39 = vmul.f32 0.03125, %v399_v38  ;;  %vm406_vm2 = vcmp.eq.f32.partialorder %v402_v37, inf  ;;  %v409_v43 = vand.u32 2147483648, %v402_v37 }
 0x23d   : > { %vm408_vm3 = vcmp.eq.f32.partialorder %v402_v37, 0.0 }
 0x23e   : > { %v403_v40 = vadd.f32 1e-05, %v401_v39 }
 0x240   : > { %606 = vrsqrt.f32 %v403_v40  ;;  %vm413_vm4 = vcmp.eq.f32.partialorder %v403_v40, inf  ;;  %v416_v48 = vand.u32 2147483648, %v403_v40  ;;  %vm415_vm5 = vcmp.eq.f32.partialorder %v403_v40, 0.0 }
 0x246   : > { %v605_v41 = vpop.eup %604 }
 0x247   : > { %v405_v42 = vmul.f32 %v605_v41, %v402_v37 }
 0x249   : > { %v407_v44 = vsel %vm406_vm2, %v402_v37, %v405_v42 }
 0x24a   : > { %v410_v45 = vsel %vm408_vm3, %v409_v43, %v407_v44  ;;  %v607_v46 = vpop.eup %606 }
 0x24b   : > { %608 = vrcp.f32 %v410_v45  ;;  %v412_v47 = vmul.f32 %v607_v46, %v403_v40 }
 0x24d   : > { %v414_v49 = vsel %vm413_vm4, %v403_v40, %v412_v47 }
 0x24e   : > { %v417_v50 = vsel %vm415_vm5, %v416_v48, %v414_v49 }
 0x24f   : > { %610 = vrcp.f32 %v417_v50 }
 0x255   : > { %v609_v51 = vpop.eup %608 }
 0x256   : > { %v419_v53 = vmul.f32 %v609_v51, %v390_v27 }
 0x258   : > { %v428_v55 = vmul.f32 %v538_v52, %v419_v53 }
 0x259   : > { %v611_v56 = vpop.eup %610 }
 0x25a   : > { %v436_v57 = vadd.f32 %v539_v54, %v428_v55  ;;  %v421_v58 = vmul.f32 %v611_v56, %v391_v31 }
 0x25c   : > { %438 = vst.msk [vmem:[%s217_s13] sm:$0xff] %vm380_vm1, %v436_v57  ;;  %v429_v59 = vmul.f32 %v538_v52, %v421_v58 }
 0x25e   : > { %v437_v60 = vadd.f32 %v539_v54, %v429_v59 }
 0x260   : > { %439 = vst.msk [vmem:[%s217_s13 + $0x8] sm:$0xff] %vm380_vm1, %v437_v60 }
 0x261   : > { %625 = shalt.err (!%p622_p3)
}
 0x262   : > { %s626_s17 = scalar_lea.hbm %s821_s23, 256  ;;  %s630_s9 = scalar_lea.hbm %s872_s5, 512 }
 0x263   : > { %p627_p4 = scmp.ne.s32.totalorder %s821_s23, %s626_s17  ;;  %p631_p9 = scmp.lt.u32.totalorder %s821_s23, %s872_s5 }
 0x264   : > { %p632_p10 = scmp.lt.u32.totalorder %s630_s9, %s626_s17  ;;  %p634_p12 = scmp.lt.u32.totalorder %s626_s17, %s821_s23 }
 0x265   : > { %p628_p7 = pnand %p627_p4, %p748_p5 }
 0x266   : > { %p633_p11 = por %p632_p10, %p631_p9 }
 0x267   : > { %p629_p8 = pneg %p628_p7 }
 0x268   : > { %p635_p13 = por %p634_p12, %p633_p11 }
 0x26a   : > { %p636_p0 = pnand %p635_p13, %p629_p8 }
 0x26c   : > { %639 = shalt.err (!%p636_p0)
}
 0x26d   : > { %s678_s12 = smov 128   ;;  %s679_s13 = smov 8  }
 0x26e   : > { %547 = dma.vmem_to_hbm [thread:$0]  (%p748_p5), %s823_s14, 256, %s821_s23, %s826_s25, %s678_s12, %s678_s12, %s679_s13  }
 0x26f PF: > { %p553_p1 = scmp.ge.s32.totalorder %s674_s21, 2  ;;  %s469_s15 = sand.u32 1, %s662_s18  }
 0x270   : > { %s470_s16 = scalar_lea.sflag [#allocation3], %s469_s15 }
 0x271   : > { %p550_p2 = pnand %p553_p1, %p752_p6 }
 0x273   : > { %657 = dma.done.wait (!%p550_p2), %s470_s16, 256  }
 0x274   : > { %659 = vsyncadd (!%p550_p2), %s470_s16, 4294967040  ;;  %p15_p3 = scmp.ge.s32.totalorder %s735_s24, 4   ;;  %s875_s18 = smov %s666_s19 }
 0x275   : > { %s876_s19 = smov %s670_s20  ;;  %s877_s20 = smov %s746_s27 }
 0x276   : > { %s878_s21 = smov %s735_s24  ;;  %17 = sbr.rel (!%p15_p3) target bundleno = 3 (0x3), region = 75 }
 0x27d   :  { %475 = vsyncpa [#allocation3], 1 }
 0x27e   :  { %477 = vsyncpa [#allocation3 + $0x1], 1 }

</bundles_post_ra>
